<compile_context>
chip_gen: v7x
topology: tpu7x:2x2x1
jax: 0.10.0
libtpu: 0.0.40
codegen_flags: <defaults>
</compile_context>

<pallas_src>
import numpy as np
import jax
import jax.numpy as jnp
from jax.experimental import pallas as pl
from jax.experimental.pallas import tpu as pltpu

_HIGH = jax.lax.Precision.HIGHEST


def _pick_tile(n, target=2048):
    """Largest multiple of 128 that divides n and is <= target, else the full dim."""
    if n % 128 != 0:
        return n
    t = 128
    while t * 2 <= target and n % (t * 2) == 0:
        t *= 2
    return t


# -----------------------------------------------------------------------------
# Kernel 1: fused per-(tile-slot, batch, pixel-block) prediction.
#   Grid point (k, b, x): the index maps gather frame f = idx[k] (scalar
#   prefetch) of every conditioning tensor; the body applies all 1x1-conv
#   stand-ins + residual adds in one pass.  Layout is (channels, pixels) with
#   the pixel axis lane-dense.
# -----------------------------------------------------------------------------
def _accum_proj(acc, w, x):
    # acc: (Cout, P)   w: (Cout, Cin)   x: (Cin, P).  Cin/Cout are tiny (3..8),
    # so unrolled VPU broadcast-FMAs (exact f32) beat a masked 4-lane MXU matmul.
    for ci in range(w.shape[1]):
        acc = acc + w[:, ci:ci + 1] * x[ci:ci + 1, :]
    return acc


def _fused_tile_pred_kernel(idx_ref, noisy_ref, ref_ref, pose_ref, hint_ref,
                            w_un_ref, w_ur_ref, w_p_ref, w_h_ref, bias_ref,
                            out_ref):
    del idx_ref                                    # consumed by the index maps
    acc = jnp.zeros(out_ref.shape, jnp.float32)
    acc = _accum_proj(acc, w_un_ref[...], noisy_ref[...])   # unet stub (noisy half)
    acc = _accum_proj(acc, w_ur_ref[...], ref_ref[...])     # unet stub (ref half)
    acc = _accum_proj(acc, w_p_ref[...], pose_ref[...])     # pose_guider
    acc = _accum_proj(acc, w_h_ref[...], hint_ref[...])     # control_net * cw
    out_ref[...] = acc + bias_ref[...]                      # all biases + clip bias


# -----------------------------------------------------------------------------
# Kernel 2: static scatter + normalisation:
#   out[b, f, :] = sum_k S[f, k] * preds[b, k, :]
#   S folds the per-tile-position weights, the frame scatter and the 1/cnt
#   normalisation (all Python-static).  K ~ num_tiles*tile_size is tiny, so the
#   contraction is unrolled VPU FMAs over a lane-dense, grid-tiled feature axis.
# -----------------------------------------------------------------------------
def _scatter_accum_kernel(s_ref, preds_ref, out_ref):
    s = s_ref[...]                                 # (F, K)
    acc = jnp.zeros(out_ref.shape, jnp.float32)    # (F, tile_d)
    for k in range(s.shape[1]):
        acc = acc + s[:, k:k + 1] * preds_ref[k:k + 1, :]
    out_ref[...] = acc


# -----------------------------------------------------------------------------
# Net.forward
# -----------------------------------------------------------------------------
def net_forward(noisy_latents, timesteps, ref_image_latents, clip_image_embeds,
                pixel_values_pose, cond, added_time_ids, params,
                tile_size=4, tile_overlap=1, control_weight=0.2):
    del timesteps, added_time_ids   # TODO(synk): consumed only by the real UNet
    B, C, num_frames, H, W = noisy_latents.shape
    npix = H * W

    hint = jnp.concatenate(cond["c_control"], axis=1)        # (B, Ch, F, H, W)

    # single upfront layout fixup (mirrors the reference .permute):
    # NCFHW -> (B, F, Cin, H*W); no further transposes anywhere downstream
    # (the final reshape back to (B, F, C, H, W) is metadata-only).
    def to_bfcp(x):
        b, c, f, h, w = x.shape
        return jnp.transpose(x, (0, 2, 1, 3, 4)).reshape(b, f, c, h * w)

    noisy = to_bfcp(noisy_latents)
    ref = to_bfcp(ref_image_latents)
    pose = to_bfcp(pixel_values_pose)
    hintc = to_bfcp(hint)
    c_pose = pose.shape[2]
    c_hint = hintc.shape[2]

    # ---- static temporal-tile schedule (identical logic to the reference) ----
    indices = [[0, *range(i + 1, min(i + tile_size, num_frames))]
               for i in range(0, num_frames - tile_size + 1, tile_size - tile_overlap)]
    if indices[-1][-1] < num_frames - 1:
        indices.append([0, *range(num_frames - tile_size + 1, num_frames)])
    n_tiles = len(indices)
    K = n_tiles * tile_size
    idx_flat = np.asarray(indices, np.int32).reshape(K)

    # static scatter matrix with tile weights and the 1/cnt normalisation folded
    wts = (np.arange(tile_size, dtype=np.float32) + 0.5) * 2.0 / tile_size
    wts = np.minimum(wts, 2.0 - wts)
    S = np.zeros((num_frames, K), np.float32)
    cnt = np.zeros((num_frames,), np.float32)
    for t, idx in enumerate(indices):
        for p, f in enumerate(idx):
            S[f, t * tile_size + p] += wts[p]
            cnt[f] += wts[p]
    S = S / cnt[:, None]           # every frame is covered by the schedule

    # ---- fold projection weights / biases (tiny, host / plain-JAX) -----------
    w_un = params["unet_w"][:C].T                        # (C, C)  noisy half
    w_ur = params["unet_w"][C:].T                        # (C, C)  ref half
    w_p = params["pose_w"].T                             # (C, Cp)
    w_h = (params["ctrl_w"] * control_weight).T          # (C, Ch) cw folded in
    clip_bias = jnp.matmul(jnp.mean(clip_image_embeds, axis=1),
                           params["clip_w"], precision=_HIGH) + params["clip_b"]
    bias = (params["unet_b"] + params["pose_b"]
            + control_weight * params["ctrl_b"])[None, :] + clip_bias   # (B, C)
    bias = bias[:, :, None].astype(jnp.float32)          # (B, C, 1)

    # ---- kernel 1: fused tile predictions ------------------------------------
    tile_pix = _pick_tile(npix)
    nx = npix // tile_pix
    gather = lambda k, b, x, idx: (b, idx[k], 0, x)

    preds = pl.pallas_call(
        _fused_tile_pred_kernel,
        out_shape=jax.ShapeDtypeStruct((B, K, C, npix), jnp.float32),
        grid_spec=pltpu.PrefetchScalarGridSpec(
            num_scalar_prefetch=1,
            grid=(K, B, nx),
            in_specs=[
                pl.BlockSpec((None, None, C, tile_pix), gather),        # noisy
                pl.BlockSpec((None, None, C, tile_pix), gather),        # ref
                pl.BlockSpec((None, None, c_pose, tile_pix), gather),   # pose
                pl.BlockSpec((None, None, c_hint, tile_pix), gather),   # hint
                pl.BlockSpec((C, C), lambda k, b, x, idx: (0, 0)),      # w_un
                pl.BlockSpec((C, C), lambda k, b, x, idx: (0, 0)),      # w_ur
                pl.BlockSpec((C, c_pose), lambda k, b, x, idx: (0, 0)), # w_p
                pl.BlockSpec((C, c_hint), lambda k, b, x, idx: (0, 0)), # w_h
                pl.BlockSpec((None, C, 1), lambda k, b, x, idx: (b, 0, 0)),  # bias
            ],
            out_specs=pl.BlockSpec((None, None, C, tile_pix),
                                   lambda k, b, x, idx: (b, k, 0, x)),
        ),
        compiler_params=pltpu.CompilerParams(
            dimension_semantics=("parallel", "parallel", "parallel")),
    )(jnp.asarray(idx_flat), noisy, ref, pose, hintc,
      w_un, w_ur, w_p, w_h, bias)

    # ---- kernel 2: static scatter + per-frame normalisation ------------------
    D = C * npix
    preds_flat = preds.reshape(B, K, D)            # trailing-dim merge: free
    tile_d = _pick_tile(D)
    nd = D // tile_d

    out_flat = pl.pallas_call(
        _scatter_accum_kernel,
        out_shape=jax.ShapeDtypeStruct((B, num_frames, D), jnp.float32),
        grid=(B, nd),
        in_specs=[
            pl.BlockSpec((num_frames, K), lambda b, x: (0, 0)),
            pl.BlockSpec((None, K, tile_d), lambda b, x: (b, 0, x)),
        ],
        out_specs=pl.BlockSpec((None, num_frames, tile_d), lambda b, x: (b, 0, x)),
        compiler_params=pltpu.CompilerParams(
            dimension_semantics=("parallel", "parallel")),
    )(jnp.asarray(S), preds_flat)

    return out_flat.reshape(B, num_frames, C, H, W)   # (B, F, C, H, W)


# -----------------------------------------------------------------------------
# Plain-JAX reference of the same forward (numerical sanity check)
# -----------------------------------------------------------------------------
def net_forward_ref(noisy_latents, timesteps, ref_image_latents, clip_image_embeds,
                    pixel_values_pose, cond, added_time_ids, params,
                    tile_size=4, tile_overlap=1, control_weight=0.2):
    num_frames = noisy_latents.shape[2]
    hint = jnp.concatenate(cond["c_control"], axis=1)
    pose_cond = jnp.transpose(pixel_values_pose, (0, 2, 1, 3, 4))
    noisy = jnp.transpose(noisy_latents, (0, 2, 1, 3, 4))
    ref = jnp.transpose(ref_image_latents, (0, 2, 1, 3, 4))
    hint_cond = jnp.transpose(hint, (0, 2, 1, 3, 4))

    def pw(x, w, b):
        return (jnp.einsum("bfihw,io->bfohw", x, w, precision=_HIGH)
                + b[None, None, :, None, None])

    pose_latents = pw(pose_cond, params["pose_w"], params["pose_b"])
    hint_latents = pw(hint_cond, params["ctrl_w"], params["ctrl_b"])

    indices = [[0, *range(i + 1, min(i + tile_size, num_frames))]
               for i in range(0, num_frames - tile_size + 1, tile_size - tile_overlap)]
    if indices[-1][-1] < num_frames - 1:
        indices.append([0, *range(num_frames - tile_size + 1, num_frames)])

    lmi = jnp.concatenate([noisy, ref], axis=2)
    weight = (jnp.arange(tile_size, dtype=jnp.float32) + 0.5) * 2.0 / tile_size
    weight = jnp.minimum(weight, 2.0 - weight)
    clip_bias = (jnp.matmul(jnp.mean(clip_image_embeds, axis=1), params["clip_w"],
                            precision=_HIGH) + params["clip_b"])

    noise_pred = jnp.zeros_like(ref)
    cnt = jnp.zeros((num_frames,), jnp.float32)
    for idx in indices:
        idxa = jnp.array(idx)
        y = (jnp.einsum("btihw,io->btohw", lmi[:, idxa], params["unet_w"],
                        precision=_HIGH)
             + params["unet_b"][None, None, :, None, None])
        y = (y + pose_latents[:, idxa] + hint_latents[:, idxa] * control_weight
             + clip_bias[:, None, :, None, None])
        noise_pred = noise_pred.at[:, idxa].add(y * weight[None, :, None, None, None])
        cnt = cnt.at[idxa].add(weight)
    return noise_pred / cnt[None, :, None, None, None]


# -----------------------------------------------------------------------------
if __name__ == "__main__":
    B, C, F, H, W = 2, 4, 6, 8, 8
    C_POSE, C_HINT_EACH, E_CLIP = 3, 2, 32
    TILE_SIZE, TILE_OVERLAP = 4, 1

    # deterministic synthetic parameters (1x1-conv stand-ins)
    pk = jax.random.PRNGKey(42)
    pks = jax.random.split(pk, 8)
    params = {
        "pose_w": 0.1 * jax.random.normal(pks[0], (C_POSE, C), jnp.float32),
        "pose_b": 0.1 * jax.random.normal(pks[1], (C,), jnp.float32),
        "ctrl_w": 0.1 * jax.random.normal(pks[2], (2 * C_HINT_EACH, C), jnp.float32),
        "ctrl_b": 0.1 * jax.random.normal(pks[3], (C,), jnp.float32),
        "unet_w": 0.1 * jax.random.normal(pks[4], (2 * C, C), jnp.float32),
        "unet_b": 0.1 * jax.random.normal(pks[5], (C,), jnp.float32),
        "clip_w": 0.1 * jax.random.normal(pks[6], (E_CLIP, C), jnp.float32),
        "clip_b": 0.1 * jax.random.normal(pks[7], (C,), jnp.float32),
    }

    # deterministic example inputs (PyTorch NCFHW conventions)
    ik = jax.random.PRNGKey(0)
    iks = jax.random.split(ik, 8)
    noisy_latents = jax.random.normal(iks[0], (B, C, F, H, W), jnp.float32)
    ref_image_latents = jax.random.normal(iks[1], (B, C, F, H, W), jnp.float32)
    pixel_values_pose = jax.random.normal(iks[2], (B, C_POSE, F, H, W), jnp.float32)
    cond = {"c_control": [
        jax.random.normal(iks[3], (B, C_HINT_EACH, F, H, W), jnp.float32),
        jax.random.normal(iks[4], (B, C_HINT_EACH, F, H, W), jnp.float32),
    ]}
    clip_image_embeds = jax.random.normal(iks[5], (B, 1, E_CLIP), jnp.float32)
    timesteps = jax.random.uniform(iks[6], (B,), jnp.float32, 0.0, 1000.0)
    added_time_ids = jax.random.normal(iks[7], (B, 3), jnp.float32)

    out = net_forward(noisy_latents, timesteps, ref_image_latents, clip_image_embeds,
                      pixel_values_pose, cond, added_time_ids, params,
                      tile_size=TILE_SIZE, tile_overlap=TILE_OVERLAP)
    out = jax.block_until_ready(out)

    ref_out = net_forward_ref(noisy_latents, timesteps, ref_image_latents,
                              clip_image_embeds, pixel_values_pose, cond,
                              added_time_ids, params,
                              tile_size=TILE_SIZE, tile_overlap=TILE_OVERLAP)
    ref_out = jax.block_until_ready(ref_out)

    assert out.shape == (B, F, C, H, W), out.shape
    assert jnp.allclose(out, ref_out, rtol=1e-4, atol=1e-4), \
        float(jnp.max(jnp.abs(out - ref_out)))
    print("KERNEL_OK")
</pallas_src>

<mosaic_0001>
module attributes {stable_mosaic.version = 11 : i64} {
  func.func @_fused_tile_pred_kernel(%arg0: i32, %arg1: i32, %arg2: i32, %arg3: memref<8xi32, #tpu.memory_space<smem>>, %arg4: memref<1x1x4x64xf32, #tpu.memory_space<vmem>>, %arg5: memref<1x1x4x64xf32, #tpu.memory_space<vmem>>, %arg6: memref<1x1x3x64xf32, #tpu.memory_space<vmem>>, %arg7: memref<1x1x4x64xf32, #tpu.memory_space<vmem>>, %arg8: memref<4x4xf32, #tpu.memory_space<vmem>>, %arg9: memref<4x4xf32, #tpu.memory_space<vmem>>, %arg10: memref<4x3xf32, #tpu.memory_space<vmem>>, %arg11: memref<4x4xf32, #tpu.memory_space<vmem>>, %arg12: memref<1x4x1xf32, #tpu.memory_space<vmem>>, %arg13: memref<1x1x4x64xf32, #tpu.memory_space<vmem>>) attributes {dimension_semantics = [#tpu.dimension_semantics<parallel>, #tpu.dimension_semantics<parallel>, #tpu.dimension_semantics<parallel>], iteration_bounds = array<i64: 8, 2, 1>, scalar_prefetch = 1 : i64, scratch_operands = 0 : i64, tpu.core_type = #tpu.core_type<tc>, window_params = [{transform_indices = @transform_0, window_bounds = array<i64: 1, 1, 4, 64>}, {transform_indices = @transform_1, window_bounds = array<i64: 1, 1, 4, 64>}, {transform_indices = @transform_2, window_bounds = array<i64: 1, 1, 3, 64>}, {transform_indices = @transform_3, window_bounds = array<i64: 1, 1, 4, 64>}, {pipeline_mode = #tpu.pipeline_mode<synchronous>, transform_indices = @transform_4, window_bounds = array<i64: 4, 4>}, {pipeline_mode = #tpu.pipeline_mode<synchronous>, transform_indices = @transform_5, window_bounds = array<i64: 4, 4>}, {pipeline_mode = #tpu.pipeline_mode<synchronous>, transform_indices = @transform_6, window_bounds = array<i64: 4, 3>}, {pipeline_mode = #tpu.pipeline_mode<synchronous>, transform_indices = @transform_7, window_bounds = array<i64: 4, 4>}, {transform_indices = @transform_8, window_bounds = array<i64: 1, 4, 1>}, {transform_indices = @transform_9, window_bounds = array<i64: 1, 1, 4, 64>}]} {
    %cst = arith.constant 0.000000e+00 : f32
    %0 = vector.broadcast %cst : f32 to vector<4x64xf32>
    %c0 = arith.constant 0 : index
    %c0_0 = arith.constant 0 : index
    %1 = vector.load %arg8[%c0, %c0_0] : memref<4x4xf32, #tpu.memory_space<vmem>>, vector<4x4xf32>
    %c0_1 = arith.constant 0 : index
    %c0_2 = arith.constant 0 : index
    %c0_3 = arith.constant 0 : index
    %c0_4 = arith.constant 0 : index
    %2 = vector.load %arg4[%c0_1, %c0_2, %c0_3, %c0_4] : memref<1x1x4x64xf32, #tpu.memory_space<vmem>>, vector<1x1x4x64xf32>
    %3 = vector.shape_cast %2 : vector<1x1x4x64xf32> to vector<4x64xf32>
    %4 = vector.extract_strided_slice %1 {offsets = [0, 0], sizes = [4, 1], strides = [1, 1]} : vector<4x4xf32> to vector<4x1xf32>
    %5 = vector.extract_strided_slice %3 {offsets = [0, 0], sizes = [1, 64], strides = [1, 1]} : vector<4x64xf32> to vector<1x64xf32>
    %6 = vector.broadcast %4 : vector<4x1xf32> to vector<4x64xf32>
    %7 = vector.broadcast %5 : vector<1x64xf32> to vector<4x64xf32>
    %8 = arith.mulf %6, %7 : vector<4x64xf32>
    %9 = arith.addf %0, %8 : vector<4x64xf32>
    %10 = vector.extract_strided_slice %1 {offsets = [0, 1], sizes = [4, 1], strides = [1, 1]} : vector<4x4xf32> to vector<4x1xf32>
    %11 = vector.extract_strided_slice %3 {offsets = [1, 0], sizes = [1, 64], strides = [1, 1]} : vector<4x64xf32> to vector<1x64xf32>
    %12 = vector.broadcast %10 : vector<4x1xf32> to vector<4x64xf32>
    %13 = vector.broadcast %11 : vector<1x64xf32> to vector<4x64xf32>
    %14 = arith.mulf %12, %13 : vector<4x64xf32>
    %15 = arith.addf %9, %14 : vector<4x64xf32>
    %16 = vector.extract_strided_slice %1 {offsets = [0, 2], sizes = [4, 1], strides = [1, 1]} : vector<4x4xf32> to vector<4x1xf32>
    %17 = vector.extract_strided_slice %3 {offsets = [2, 0], sizes = [1, 64], strides = [1, 1]} : vector<4x64xf32> to vector<1x64xf32>
    %18 = vector.broadcast %16 : vector<4x1xf32> to vector<4x64xf32>
    %19 = vector.broadcast %17 : vector<1x64xf32> to vector<4x64xf32>
    %20 = arith.mulf %18, %19 : vector<4x64xf32>
    %21 = arith.addf %15, %20 : vector<4x64xf32>
    %22 = vector.extract_strided_slice %1 {offsets = [0, 3], sizes = [4, 1], strides = [1, 1]} : vector<4x4xf32> to vector<4x1xf32>
    %23 = vector.extract_strided_slice %3 {offsets = [3, 0], sizes = [1, 64], strides = [1, 1]} : vector<4x64xf32> to vector<1x64xf32>
    %24 = vector.broadcast %22 : vector<4x1xf32> to vector<4x64xf32>
    %25 = vector.broadcast %23 : vector<1x64xf32> to vector<4x64xf32>
    %26 = arith.mulf %24, %25 : vector<4x64xf32>
    %27 = arith.addf %21, %26 : vector<4x64xf32>
    %c0_5 = arith.constant 0 : index
    %c0_6 = arith.constant 0 : index
    %28 = vector.load %arg9[%c0_5, %c0_6] : memref<4x4xf32, #tpu.memory_space<vmem>>, vector<4x4xf32>
    %c0_7 = arith.constant 0 : index
    %c0_8 = arith.constant 0 : index
    %c0_9 = arith.constant 0 : index
    %c0_10 = arith.constant 0 : index
    %29 = vector.load %arg5[%c0_7, %c0_8, %c0_9, %c0_10] : memref<1x1x4x64xf32, #tpu.memory_space<vmem>>, vector<1x1x4x64xf32>
    %30 = vector.shape_cast %29 : vector<1x1x4x64xf32> to vector<4x64xf32>
    %31 = vector.extract_strided_slice %28 {offsets = [0, 0], sizes = [4, 1], strides = [1, 1]} : vector<4x4xf32> to vector<4x1xf32>
    %32 = vector.extract_strided_slice %30 {offsets = [0, 0], sizes = [1, 64], strides = [1, 1]} : vector<4x64xf32> to vector<1x64xf32>
    %33 = vector.broadcast %31 : vector<4x1xf32> to vector<4x64xf32>
    %34 = vector.broadcast %32 : vector<1x64xf32> to vector<4x64xf32>
    %35 = arith.mulf %33, %34 : vector<4x64xf32>
    %36 = arith.addf %27, %35 : vector<4x64xf32>
    %37 = vector.extract_strided_slice %28 {offsets = [0, 1], sizes = [4, 1], strides = [1, 1]} : vector<4x4xf32> to vector<4x1xf32>
    %38 = vector.extract_strided_slice %30 {offsets = [1, 0], sizes = [1, 64], strides = [1, 1]} : vector<4x64xf32> to vector<1x64xf32>
    %39 = vector.broadcast %37 : vector<4x1xf32> to vector<4x64xf32>
    %40 = vector.broadcast %38 : vector<1x64xf32> to vector<4x64xf32>
    %41 = arith.mulf %39, %40 : vector<4x64xf32>
    %42 = arith.addf %36, %41 : vector<4x64xf32>
    %43 = vector.extract_strided_slice %28 {offsets = [0, 2], sizes = [4, 1], strides = [1, 1]} : vector<4x4xf32> to vector<4x1xf32>
    %44 = vector.extract_strided_slice %30 {offsets = [2, 0], sizes = [1, 64], strides = [1, 1]} : vector<4x64xf32> to vector<1x64xf32>
    %45 = vector.broadcast %43 : vector<4x1xf32> to vector<4x64xf32>
    %46 = vector.broadcast %44 : vector<1x64xf32> to vector<4x64xf32>
    %47 = arith.mulf %45, %46 : vector<4x64xf32>
    %48 = arith.addf %42, %47 : vector<4x64xf32>
    %49 = vector.extract_strided_slice %28 {offsets = [0, 3], sizes = [4, 1], strides = [1, 1]} : vector<4x4xf32> to vector<4x1xf32>
    %50 = vector.extract_strided_slice %30 {offsets = [3, 0], sizes = [1, 64], strides = [1, 1]} : vector<4x64xf32> to vector<1x64xf32>
    %51 = vector.broadcast %49 : vector<4x1xf32> to vector<4x64xf32>
    %52 = vector.broadcast %50 : vector<1x64xf32> to vector<4x64xf32>
    %53 = arith.mulf %51, %52 : vector<4x64xf32>
    %54 = arith.addf %48, %53 : vector<4x64xf32>
    %c0_11 = arith.constant 0 : index
    %c0_12 = arith.constant 0 : index
    %55 = vector.load %arg10[%c0_11, %c0_12] : memref<4x3xf32, #tpu.memory_space<vmem>>, vector<4x3xf32>
    %c0_13 = arith.constant 0 : index
    %c0_14 = arith.constant 0 : index
    %c0_15 = arith.constant 0 : index
    %c0_16 = arith.constant 0 : index
    %56 = vector.load %arg6[%c0_13, %c0_14, %c0_15, %c0_16] : memref<1x1x3x64xf32, #tpu.memory_space<vmem>>, vector<1x1x3x64xf32>
    %57 = vector.shape_cast %56 : vector<1x1x3x64xf32> to vector<3x64xf32>
    %58 = vector.extract_strided_slice %55 {offsets = [0, 0], sizes = [4, 1], strides = [1, 1]} : vector<4x3xf32> to vector<4x1xf32>
    %59 = vector.extract_strided_slice %57 {offsets = [0, 0], sizes = [1, 64], strides = [1, 1]} : vector<3x64xf32> to vector<1x64xf32>
    %60 = vector.broadcast %58 : vector<4x1xf32> to vector<4x64xf32>
    %61 = vector.broadcast %59 : vector<1x64xf32> to vector<4x64xf32>
    %62 = arith.mulf %60, %61 : vector<4x64xf32>
    %63 = arith.addf %54, %62 : vector<4x64xf32>
    %64 = vector.extract_strided_slice %55 {offsets = [0, 1], sizes = [4, 1], strides = [1, 1]} : vector<4x3xf32> to vector<4x1xf32>
    %65 = vector.extract_strided_slice %57 {offsets = [1, 0], sizes = [1, 64], strides = [1, 1]} : vector<3x64xf32> to vector<1x64xf32>
    %66 = vector.broadcast %64 : vector<4x1xf32> to vector<4x64xf32>
    %67 = vector.broadcast %65 : vector<1x64xf32> to vector<4x64xf32>
    %68 = arith.mulf %66, %67 : vector<4x64xf32>
    %69 = arith.addf %63, %68 : vector<4x64xf32>
    %70 = vector.extract_strided_slice %55 {offsets = [0, 2], sizes = [4, 1], strides = [1, 1]} : vector<4x3xf32> to vector<4x1xf32>
    %71 = vector.extract_strided_slice %57 {offsets = [2, 0], sizes = [1, 64], strides = [1, 1]} : vector<3x64xf32> to vector<1x64xf32>
    %72 = vector.broadcast %70 : vector<4x1xf32> to vector<4x64xf32>
    %73 = vector.broadcast %71 : vector<1x64xf32> to vector<4x64xf32>
    %74 = arith.mulf %72, %73 : vector<4x64xf32>
    %75 = arith.addf %69, %74 : vector<4x64xf32>
    %c0_17 = arith.constant 0 : index
    %c0_18 = arith.constant 0 : index
    %76 = vector.load %arg11[%c0_17, %c0_18] : memref<4x4xf32, #tpu.memory_space<vmem>>, vector<4x4xf32>
    %c0_19 = arith.constant 0 : index
    %c0_20 = arith.constant 0 : index
    %c0_21 = arith.constant 0 : index
    %c0_22 = arith.constant 0 : index
    %77 = vector.load %arg7[%c0_19, %c0_20, %c0_21, %c0_22] : memref<1x1x4x64xf32, #tpu.memory_space<vmem>>, vector<1x1x4x64xf32>
    %78 = vector.shape_cast %77 : vector<1x1x4x64xf32> to vector<4x64xf32>
    %79 = vector.extract_strided_slice %76 {offsets = [0, 0], sizes = [4, 1], strides = [1, 1]} : vector<4x4xf32> to vector<4x1xf32>
    %80 = vector.extract_strided_slice %78 {offsets = [0, 0], sizes = [1, 64], strides = [1, 1]} : vector<4x64xf32> to vector<1x64xf32>
    %81 = vector.broadcast %79 : vector<4x1xf32> to vector<4x64xf32>
    %82 = vector.broadcast %80 : vector<1x64xf32> to vector<4x64xf32>
    %83 = arith.mulf %81, %82 : vector<4x64xf32>
    %84 = arith.addf %75, %83 : vector<4x64xf32>
    %85 = vector.extract_strided_slice %76 {offsets = [0, 1], sizes = [4, 1], strides = [1, 1]} : vector<4x4xf32> to vector<4x1xf32>
    %86 = vector.extract_strided_slice %78 {offsets = [1, 0], sizes = [1, 64], strides = [1, 1]} : vector<4x64xf32> to vector<1x64xf32>
    %87 = vector.broadcast %85 : vector<4x1xf32> to vector<4x64xf32>
    %88 = vector.broadcast %86 : vector<1x64xf32> to vector<4x64xf32>
    %89 = arith.mulf %87, %88 : vector<4x64xf32>
    %90 = arith.addf %84, %89 : vector<4x64xf32>
    %91 = vector.extract_strided_slice %76 {offsets = [0, 2], sizes = [4, 1], strides = [1, 1]} : vector<4x4xf32> to vector<4x1xf32>
    %92 = vector.extract_strided_slice %78 {offsets = [2, 0], sizes = [1, 64], strides = [1, 1]} : vector<4x64xf32> to vector<1x64xf32>
    %93 = vector.broadcast %91 : vector<4x1xf32> to vector<4x64xf32>
    %94 = vector.broadcast %92 : vector<1x64xf32> to vector<4x64xf32>
    %95 = arith.mulf %93, %94 : vector<4x64xf32>
    %96 = arith.addf %90, %95 : vector<4x64xf32>
    %97 = vector.extract_strided_slice %76 {offsets = [0, 3], sizes = [4, 1], strides = [1, 1]} : vector<4x4xf32> to vector<4x1xf32>
    %98 = vector.extract_strided_slice %78 {offsets = [3, 0], sizes = [1, 64], strides = [1, 1]} : vector<4x64xf32> to vector<1x64xf32>
    %99 = vector.broadcast %97 : vector<4x1xf32> to vector<4x64xf32>
    %100 = vector.broadcast %98 : vector<1x64xf32> to vector<4x64xf32>
    %101 = arith.mulf %99, %100 : vector<4x64xf32>
    %102 = arith.addf %96, %101 : vector<4x64xf32>
    %c0_23 = arith.constant 0 : index
    %c0_24 = arith.constant 0 : index
    %c0_25 = arith.constant 0 : index
    %103 = vector.load %arg12[%c0_23, %c0_24, %c0_25] : memref<1x4x1xf32, #tpu.memory_space<vmem>>, vector<1x4x1xf32>
    %104 = vector.shape_cast %103 : vector<1x4x1xf32> to vector<4x1xf32>
    %105 = vector.broadcast %104 : vector<4x1xf32> to vector<4x64xf32>
    %106 = arith.addf %102, %105 : vector<4x64xf32>
    %c0_26 = arith.constant 0 : index
    %c0_27 = arith.constant 0 : index
    %c0_28 = arith.constant 0 : index
    %c0_29 = arith.constant 0 : index
    %107 = vector.load %arg13[%c0_26, %c0_27, %c0_28, %c0_29] : memref<1x1x4x64xf32, #tpu.memory_space<vmem>>, vector<1x1x4x64xf32>
    %108 = vector.shape_cast %107 : vector<1x1x4x64xf32> to vector<4x64xf32>
    %109 = vector.shape_cast %106 : vector<4x64xf32> to vector<1x1x4x64xf32>
    tpu.vector_store %arg13[%c0_26, %c0_27, %c0_28, %c0_29], %109 {strides = array<i32>} : memref<1x1x4x64xf32, #tpu.memory_space<vmem>>, vector<1x1x4x64xf32>,
    return
  }
  func.func @transform_0(%arg0: i32, %arg1: i32, %arg2: i32, %arg3: memref<8xi32, #tpu.memory_space<smem>>) -> (i32, i32, i32, i32) {
    %0 = arith.index_cast %arg0 : i32 to index
    %1 = memref.load %arg3[%0] : memref<8xi32, #tpu.memory_space<smem>>
    %c0_i32 = arith.constant 0 : i32
    %c0_i32_0 = arith.constant 0 : i32
    return %arg1, %1, %c0_i32, %arg2 : i32, i32, i32, i32
  }
  func.func @transform_1(%arg0: i32, %arg1: i32, %arg2: i32, %arg3: memref<8xi32, #tpu.memory_space<smem>>) -> (i32, i32, i32, i32) {
    %0 = arith.index_cast %arg0 : i32 to index
    %1 = memref.load %arg3[%0] : memref<8xi32, #tpu.memory_space<smem>>
    %c0_i32 = arith.constant 0 : i32
    %c0_i32_0 = arith.constant 0 : i32
    return %arg1, %1, %c0_i32, %arg2 : i32, i32, i32, i32
  }
  func.func @transform_2(%arg0: i32, %arg1: i32, %arg2: i32, %arg3: memref<8xi32, #tpu.memory_space<smem>>) -> (i32, i32, i32, i32) {
    %0 = arith.index_cast %arg0 : i32 to index
    %1 = memref.load %arg3[%0] : memref<8xi32, #tpu.memory_space<smem>>
    %c0_i32 = arith.constant 0 : i32
    %c0_i32_0 = arith.constant 0 : i32
    return %arg1, %1, %c0_i32, %arg2 : i32, i32, i32, i32
  }
  func.func @transform_3(%arg0: i32, %arg1: i32, %arg2: i32, %arg3: memref<8xi32, #tpu.memory_space<smem>>) -> (i32, i32, i32, i32) {
    %0 = arith.index_cast %arg0 : i32 to index
    %1 = memref.load %arg3[%0] : memref<8xi32, #tpu.memory_space<smem>>
    %c0_i32 = arith.constant 0 : i32
    %c0_i32_0 = arith.constant 0 : i32
    return %arg1, %1, %c0_i32, %arg2 : i32, i32, i32, i32
  }
  func.func @transform_4(%arg0: i32, %arg1: i32, %arg2: i32, %arg3: memref<8xi32, #tpu.memory_space<smem>>) -> (i32, i32) {
    %c0_i32 = arith.constant 0 : i32
    %c0_i32_0 = arith.constant 0 : i32
    %c0_i32_1 = arith.constant 0 : i32
    return %c0_i32, %c0_i32_0 : i32, i32
  }
  func.func @transform_5(%arg0: i32, %arg1: i32, %arg2: i32, %arg3: memref<8xi32, #tpu.memory_space<smem>>) -> (i32, i32) {
    %c0_i32 = arith.constant 0 : i32
    %c0_i32_0 = arith.constant 0 : i32
    %c0_i32_1 = arith.constant 0 : i32
    return %c0_i32, %c0_i32_0 : i32, i32
  }
  func.func @transform_6(%arg0: i32, %arg1: i32, %arg2: i32, %arg3: memref<8xi32, #tpu.memory_space<smem>>) -> (i32, i32) {
    %c0_i32 = arith.constant 0 : i32
    %c0_i32_0 = arith.constant 0 : i32
    %c0_i32_1 = arith.constant 0 : i32
    return %c0_i32, %c0_i32_0 : i32, i32
  }
  func.func @transform_7(%arg0: i32, %arg1: i32, %arg2: i32, %arg3: memref<8xi32, #tpu.memory_space<smem>>) -> (i32, i32) {
    %c0_i32 = arith.constant 0 : i32
    %c0_i32_0 = arith.constant 0 : i32
    %c0_i32_1 = arith.constant 0 : i32
    return %c0_i32, %c0_i32_0 : i32, i32
  }
  func.func @transform_8(%arg0: i32, %arg1: i32, %arg2: i32, %arg3: memref<8xi32, #tpu.memory_space<smem>>) -> (i32, i32, i32) {
    %c0_i32 = arith.constant 0 : i32
    %c0_i32_0 = arith.constant 0 : i32
    %c0_i32_1 = arith.constant 0 : i32
    return %arg1, %c0_i32, %c0_i32_0 : i32, i32, i32
  }
  func.func @transform_9(%arg0: i32, %arg1: i32, %arg2: i32, %arg3: memref<8xi32, #tpu.memory_space<smem>>) -> (i32, i32, i32, i32) {
    %c0_i32 = arith.constant 0 : i32
    %c0_i32_0 = arith.constant 0 : i32
    return %arg1, %arg0, %c0_i32, %arg2 : i32, i32, i32, i32
  }
}

</mosaic_0001>

<bundles_post_ra>
// kernel: tpu_custom_call.1
= control target key start
LH: loop header
LB: loop body
LE: loop exit
PB: predicated region body
PF: predicated region fallthrough
CT: control target
= control target key end

     0   :  { %s1569_s0 = inlined_call_operand.hbm [shape: s32[8], index: 0, kind: input, shape index: {}]   ;;  %s1570_s1 = inlined_call_operand.vmem [shape: f32[2,6,4,64], index: 1, kind: input, shape index: {}]   ;;  %s1571_s2 = inlined_call_operand.vmem [shape: f32[2,6,4,64], index: 2, kind: input, shape index: {}]   ;;  %s1572_s3 = inlined_call_operand.vmem [shape: f32[2,6,3,64], index: 3, kind: input, shape index: {}]   ;;  %s1573_s4 = inlined_call_operand.hbm [shape: f32[2,6,4,64], index: 4, kind: input, shape index: {}]   ;;  %s1574_s5 = inlined_call_operand.vmem [shape: f32[4,4], index: 5, kind: input, shape index: {}]   ;;  %s1575_s6 = inlined_call_operand.vmem [shape: f32[4,4], index: 6, kind: input, shape index: {}]   ;;  %s1576_s7 = inlined_call_operand.vmem [shape: f32[4,3], index: 7, kind: input, shape index: {}]   ;;  %s1577_s8 = inlined_call_operand.vmem [shape: f32[4,4], index: 8, kind: input, shape index: {}]   ;;  %s1578_s9 = inlined_call_operand.vmem [shape: f32[2,4,1], index: 9, kind: input, shape index: {}]   ;;  %s1579_s10 = inlined_call_operand.hbm [shape: f32[2,8,4,64], index: 10, kind: output, shape index: {}]  }
   0x1   :  { %1590 = sst [smem:[#allocation22_spill]] %s1572_s3  ;;  %s1049_s15 = scalar_lea.hbm %s1569_s0, 16 }
   0x2   :  { %1591 = sst [smem:[#allocation23_spill]] %s1579_s10  ;;  %p1050_p0 = scmp.ne.s32.totalorder %s1569_s0, %s1049_s15 }
   0x3   :  { %p1053_p1 = scmp.lt.u32.totalorder %s1049_s15, %s1569_s0 }
   0x5   :  { %p1055_p2 = pnand %p1053_p1, %p1050_p0 }
   0x7   :  { %1058 = shalt.err (!%p1055_p2)  }
   0x8   :  { %s1215_s20 = smov [#allocation3]  }
   0x9   :  { %16 = dma.hbm_to_smem %s1569_s0, 16, %s1215_s20, [#allocation2] }
   0xa   :  { %1161 = dma.done.wait [#allocation2], 16 }
   0xb   :  { %1162 = vsyncadd [#allocation2], 4294967280 }
   0xc   :  { %18 = sfence }
   0xd   :  { %19 = vsyncpa [#allocation5], 0 }
   0xe   :  { %21 = vsyncpa [#allocation5 + $0x1], 0 }
   0xf   :  { %22 = vsyncpa [#allocation6], 0 }
  0x10   :  { %24 = vsyncpa [#allocation6 + $0x1], 0  ;;  %s1289_s23 = smov 0   ;;  %s1291_s24 = smov 0  }
  0x11   :  { %s1293_s25 = smov 0   ;;  %s1295_s26 = smov 0  }
  0x12   :  { %s1297_s27 = smov 0   ;;  %s1299_s28 = smov 0  }
  0x13   :  { %s1301_s0 = smov 0   ;;  %s1303_s29 = smov 0  }
  0x14   :  { %s1305_s30 = smov 0   ;;  %s1307_s11 = smov 0  }
  0x15   :  { %s1309_s12 = smov 0  }
  0x16 LB: > { %1592 = sst [smem:[#allocation13_spill]] %s1173_s23  ;;  %s904_s13 = sadd.s32 4294967295, %s1213_s12   ;;  %s1213_s12 = sphi %s1309_s12, %s30_s12   ;;  %s1209_s11 = sphi %s1307_s11, %s1620_s11   ;;  %s1205_s30 = sphi %s1305_s30, %s1626_s30   ;;  %s1201_s29 = sphi %s1303_s29, %s1618_s29   ;;  %s1197_s0 = sphi %s1301_s0, %s1625_s0   ;;  %s1193_s28 = sphi %s1299_s28, %s1617_s28   ;;  %s1189_s27 = sphi %s1297_s27, %s1624_s27   ;;  %s1185_s26 = sphi %s1295_s26, %s1623_s26   ;;  %s1181_s25 = sphi %s1293_s25, %s1615_s25   ;;  %s1177_s24 = sphi %s1291_s24, %s1622_s24   ;;  %s1173_s23 = sphi %s1289_s23, %s1621_s23  }
  0x17   : > { %1593 = sst [smem:[#allocation14_spill]] %s1181_s25  ;;  %s905_s14 = sadd.s32 4294967294, %s1213_s12  }
  0x18   : > { %1594 = sst [smem:[#allocation15_spill]] %s1193_s28  ;;  %s45_s15 = sadd.s32 1, %s1205_s30 }
  0x19   : > { %1595 = sst [smem:[#allocation16_spill]] %s1209_s11  ;;  %p47_p3 = scmp.ge.s32.totalorder %s45_s15, 2 }
  0x1a   : > { %s49_s16 = sadd.s32 1, %s1209_s11  ;;  %s149_s17 = sld [smem:[#allocation3 + %s1209_s11]] }
  0x1b   : > { %s1628_s15 = smov (%p47_p3, %s45_s15), 0  ;;  %s1630_s16 = smov (!%p47_p3, %s49_s16), %s1209_s11 }
  0x1c   : > { %1596 = sst [smem:[#allocation17_spill]] %s1628_s15  ;;  %s151_s19 = ssub.s32 %s1205_s30, %s1628_s15 }
  0x1d   : > { %p165_p4 = scmp.ne.s32.totalorder %s1193_s28, %s1189_s27  ;;  %p51_p5 = scmp.ge.s32.totalorder %s1630_s16, 8 }
  0x1e   : > { %p171_p6 = scmp.ne.s32.totalorder %s1189_s27, %s1185_s26  ;;  %p166_p7 = scmp.eq.s32.totalorder %s1213_s12, 0 }
  0x1f   : > { %p172_p8 = scmp.eq.s32.totalorder %s904_s13, 0  ;;  %s1632_s16 = smov (%p51_p5, %s1630_s16), 0 }
  0x20   : > { %1597 = sst [smem:[#allocation18_spill]] %s1632_s16  ;;  %s298_s21 = sadd.s32 1, %s1181_s25 }
  0x21   : > { %p1359_p9 = por %p172_p8, %p171_p6  ;;  %s150_s22 = sld [smem:[#allocation3 + %s1632_s16]] }
  0x22   : > { %s292_s18 = ssub.s32 %s1209_s11, %s1632_s16  ;;  %p308_p10 = scmp.ne.s32.totalorder %s1181_s25, %s1177_s24 }
  0x23   : > { %s1598_s20 = scalar_select %p1359_p9, 1, 0 }
  0x24   : > { %s293_s26 = sor.u32 %s292_s18, %s151_s19  ;;  %p309_p12 = scmp.eq.s32.totalorder %s904_s13, 15 }
  0x25   : > { %p296_p11 = scmp.eq.s32.totalorder %s293_s26, 0  ;;  %p314_p13 = scmp.ne.s32.totalorder %s1177_s24, %s1173_s23 }
  0x26   : > { %p315_p0 = scmp.eq.s32.totalorder %s905_s14, 15  ;;  %p1374_p1 = por %p309_p12, %p308_p10 }
  0x27   : > { %s1372_s15 = scalar_select %p296_p11, %s1181_s25, %s298_s21  }
  0x28   : > { %s1600_s10 = scalar_select %p1374_p1, 1, 0 }
  0x29   : > { %1599 = sst [smem:[#allocation19_spill]] %s1372_s15  ;;  %p1378_p2 = por %p315_p0, %p314_p13 }
  0x2a   : > { %s152_s16 = ssub.s32 %s149_s17, %s150_s22  ;;  %p167_p3 = por %p166_p7, %p165_p4 }
  0x2b   : > { %s1601_s3 = scalar_select %p1378_p2, 1, 0 }
  0x2c   : > { %s153_s18 = sor.u32 %s152_s16, %s151_s19  ;;  %s395_s13 = sand.u32 1, %s1193_s28  }
  0x2d   : > { %1602 = sst [smem:[#allocation20_spill]] %s1601_s3  ;;  %p156_p5 = scmp.eq.s32.totalorder %s153_s18, 0 }
  0x2e   : > { %p940_p6 = scmp.lt.s32.totalorder %s1213_s12, 16  ;;  %s1603_s14 = sadd.s32 1, %s1193_s28 }
  0x2f   : > { %s1392_s21 = scalar_select %p156_p5, %s1193_s28, %s1603_s14  }
  0x30   : > { %s908_s26 = sshll.u32 %s395_s13, 2  ;;  %p1395_p8 = pnand %p940_p6, %p167_p3 }
  0x31   : > { %1604 = sst [smem:[#allocation21_spill]] %s1392_s21  ;;  %p910_p10 = scmp.ge.s32.totalorder %s1213_s12, 1 }
  0x32   : > { %s924_s15 = scalar_select %p167_p3, [#allocation3], [#allocation8] }
  0x33   : > { %s925_s25 = scalar_select %p167_p3, %s1209_s11, 0 }
  0x34   : > { %s1634_s15 = smov (!%p940_p6, %s924_s15), [#allocation9]  ;;  %s922_s17 = smul.u32 6, %s1205_s30 }
  0x35   : > { %s1636_s25 = smov (!%p940_p6, %s925_s25), 0  ;;  %p422_p4 = scmp.lt.s32.totalorder %s1213_s12, 17 }
  0x36   : > { %s400_s16 = sld [smem:[%s1634_s15 + %s1636_s25]]  ;;  %s399_s19 = scalar_lea.vmem [#allocation4], %s908_s26 }
  0x37   : > { %s410_s22 = sshll.u32 %s399_s19, 4  ;;  %p1402_p7 = pnand %p910_p10, %p422_p4  ;;  %s1406_s22 = int_to_ptr.vmem [resolvable:$true] %s410_s22 }
  0x38   : > { %s396_s25 = scalar_lea.sflag [#allocation5], %s395_s13  ;;  %p1061_p12 = pneg %p1395_p8 }
  0x3c   : > { %s406_s14 = sadd.s32 %s922_s17, %s400_s16  ;;  %s1064_s17 = scalar_lea.hbm %s1573_s4, 768 }
  0x3d   : > { %s909_s11 = sshll.u32 %s406_s14, 6 }
  0x3e   : > { %s1411_s23 = scalar_lea.hbm %s1573_s4, %s909_s11 }
  0x3f   : > { %s1059_s15 = scalar_lea.hbm %s1411_s23, 64  ;;  %p1065_p3 = scmp.lt.u32.totalorder %s1411_s23, %s1573_s4 }
  0x40   : > { %p1060_p11 = scmp.ne.s32.totalorder %s1411_s23, %s1059_s15  ;;  %p1066_p5 = scmp.lt.u32.totalorder %s1064_s17, %s1059_s15 }
  0x41   : > { %p1068_p10 = scmp.lt.u32.totalorder %s1059_s15, %s1411_s23 }
  0x42   : > { %p1062_p13 = pnand %p1061_p12, %p1060_p11  ;;  %p1067_p6 = por %p1066_p5, %p1065_p3 }
  0x44   : > { %p1063_p0 = pneg %p1062_p13  ;;  %p1069_p4 = por %p1068_p10, %p1067_p6 }
  0x46   : > { %p1070_p2 = pnand %p1069_p4, %p1063_p0 }
  0x48   : > { %1073 = shalt.err (!%p1070_p2)
}
  0x49   : > { %s1074_s13 = scalar_lea.vmem %s1406_s22, 64  ;;  %s1216_s21 = smov [#allocation4]  }
  0x4a   : > { %p1075_p11 = scmp.ne.s32.totalorder %s1406_s22, %s1074_s13  ;;  %s1079_s19 = sshll.u32 %s1216_s21, 4  ;;  %s1080_s19 = int_to_ptr.vmem [resolvable:$false] %s1079_s19 }
  0x4b   : > { %s1081_s14 = scalar_lea.vmem %s1080_s19, 128  ;;  %p1082_p9 = scmp.lt.s32.totalorder %s1406_s22, %s1080_s19 }
  0x4c   : > { %p1077_p13 = pnand %p1075_p11, %p1061_p12  ;;  %p1083_p3 = scmp.lt.s32.totalorder %s1081_s14, %s1074_s13 }
  0x4e   : > { %p1078_p1 = pneg %p1077_p13  ;;  %p1084_p5 = por %p1083_p3, %p1082_p9 }
  0x50   : > { %p1085_p6 = pnand %p1084_p5, %p1078_p1 }
  0x52   : > { %1088 = shalt.err (!%p1085_p6)
}
  0x53   : > { %935 = dma.hbm_to_vmem [thread:$0]  (!%p1395_p8), %s1411_s23, 64, %s1406_s22, %s396_s25  }
  0x54   : > { %426 = sbr.rel (%p1402_p7) target bundleno = 282 (0x11a), region = 56  ;;  %s428_s15 = sand.u32 (!%p1402_p7), 1, %s1189_s27  }
  0x55   : > { %s1441_s26 = sshll.u32 (!%p1402_p7), %s428_s15, 2  ;;  %s429_s16 = scalar_lea.sflag (!%p1402_p7), [#allocation5], %s428_s15 }
  0x56   : > { %s432_s17 = scalar_lea.vmem (!%p1402_p7), [#allocation4], %s1441_s26  ;;  %p1607_p2 = scmp.ne.s32.totalorder (!%p1402_p7), %s1598_s20, 0 }
  0x5b   : > { %1164 = dma.done.wait (%p1607_p2), %s429_s16, 64  }
  0x5c   : > { %1166 = vsyncadd (%p1607_p2), %s429_s16, 4294967232  ;;  %v1217_v0 = vmov 2   ;;  %v1218_v1 = vmov 0   ;;  %v551_v2 = vld [vmem:[%s1574_s5] sm:$0xf]  ;;  %v1219_v3 = vmov 3   ;;  %v558_v9 = vlaneseq }
  0x5d   : > { %1037 = vset.pattern.permute.xlu1 %v1217_v0  ;;  %1035 = vset.pattern.permute.xlu0 %v1218_v1  ;;  %v1220_v4 = vmov 1   ;;  %v594_v5 = vld [vmem:[%s1575_s6] sm:$0xf]  ;;  %p508_p9 = scmp.lt.s32.totalorder %s1197_s0, 1  ;;  %s507_s16 = sld [smem:[#allocation3 + %s1201_s29]]  ;;  %vm720_vm0 = vcmask 519168  }
  0x5e   : > { %575 = vperm.xlu1 %1037, %v551_v2   ;;  %555 = vperm.xlu0 %1035, %v551_v2   ;;  %v637_v6 = vld [vmem:[%s1576_s7] sm:$0xf]  ;;  %s520_s3 = sld [smem:[#allocation3 + %s1201_s29]]  ;;  %v559_v10 = vshrl.u32 %v558_v9, 7  ;;  %p1610_p0 = scmp.ne.s32.totalorder %s1600_s10, 0 }
  0x5f   : > { %s509_s18 = scalar_select %p508_p9, %s1197_s0, 1  ;;  %v670_v7 = vld [vmem:[%s1577_s8] sm:$0xf] }
  0x60   : > { %s533_s22 = sld [smem:[#allocation3 + %s1201_s29]]  ;;  %v560_v11 = vsub.s32 0, %v559_v10  ;;  %v1475_v12 = vsub.s32 1, %v559_v10  ;;  %v1477_v14 = vsub.s32 2, %v559_v10  ;;  %v1482_v18 = vsub.s32 3, %v559_v10 }
  0x61   : > { %s916_s11 = sshll.u32 %s509_s18, 2  ;;  %s1467_s23 = smul.u32 6, %s509_s18  ;;  %v671_v56 = vld [vmem:[%s432_s17] sm:$0xf] }
  0x62   : > { %1038 = vset.pattern.permute.xlu1 %v1219_v3  ;;  %1036 = vset.pattern.permute.xlu0 %v1220_v4  ;;  %s550_s15 = scalar_lea.vmem %s1578_s9, %s916_s11  ;;  %v680_v61 = vrot.slane %v671_v56, %v560_v11  ;;  %s918_s17 = sshll.u32 %s1197_s0, 3 }
  0x63   : > { %585 = vperm.xlu1 %1038, %v551_v2   ;;  %565 = vperm.xlu0 %1036, %v551_v2   ;;  %v713_v8 = vld [vmem:[%s550_s15] sm:$0xf]  ;;  %p510_p1 = scmp.lt.s32.totalorder %s507_s16, 5  ;;  %v700_v2 = vrot.slane %v671_v56, %v1477_v14 }
  0x64   : > { %p523_p8 = scmp.lt.s32.totalorder %s520_s3, 5 }
  0x65   : > { %s1638_s16 = smov (!%p510_p1, %s507_s16), 5 }
  0x66   : > { %s516_s20 = sadd.s32 %s1467_s23, %s1638_s16  ;;  %s1640_s3 = smov (!%p523_p8, %s520_s3), 5 }
  0x67   : > { %1039 = vset.pattern.permute.xlu1 %v1218_v1  ;;  %608 = vperm.xlu0 %1036, %v594_v5   ;;  %s913_s25 = sshll.u32 %s516_s20, 2  ;;  %s529_s28 = sadd.s32 %s1467_s23, %s1640_s3 }
  0x68   : > { %598 = vperm.xlu1 %1039, %v594_v5   ;;  %s518_s21 = scalar_lea.vmem %s1570_s1, %s913_s25  ;;  %s914_s18 = sshll.u32 %s529_s28, 2 }
  0x69   : > { %p536_p7 = scmp.lt.s32.totalorder %s533_s22, 5  ;;  %v552_v13 = vld [vmem:[%s518_s21] sm:$0xf]  ;;  %s531_s15 = scalar_lea.vmem %s1571_s2, %s914_s18 }
  0x6a   : > { %v561_v17 = vrot.slane %v552_v13, %v560_v11  ;;  %v571_v19 = vrot.slane %v552_v13, %v1475_v12  ;;  %v581_v20 = vrot.slane %v552_v13, %v1477_v14  ;;  %v595_v22 = vld [vmem:[%s531_s15] sm:$0xf]  ;;  %v591_v25 = vrot.slane %v552_v13, %v1482_v18  ;;  %s1608_s28 = sld [smem:[#allocation22_spill]]  ;;  %s1609_s15 = sld [smem:[#allocation23_spill]] }
  0x6b   : > { %1041 = vset.pattern.permute.xlu0 %v1219_v3  ;;  %s1642_s22 = smov (!%p536_p7, %s533_s22), 5  ;;  %v604_v27 = vrot.slane %v595_v22, %v560_v11  ;;  %v614_v30 = vrot.slane %v595_v22, %v1475_v12  ;;  %v624_v38 = vrot.slane %v595_v22, %v1477_v14  ;;  %v634_v40 = vrot.slane %v595_v22, %v1482_v18 }
  0x6c   : > { %1040 = vset.pattern.permute.xlu1 %v1217_v0  ;;  %628 = vperm.xlu0 %1041, %v594_v5   ;;  %s542_s16 = sadd.s32 %s1467_s23, %s1642_s22  ;;  %s504_s23 = sand.u32 1, %s1177_s24  }
  0x6d   : > { %618 = vperm.xlu1 %1040, %v594_v5   ;;  %s915_s3 = sshll.u32 %s542_s16, 2  ;;  %s912_s26 = sshll.u32 %s504_s23, 2 }
  0x6e   : > { %s735_s22 = sadd.s32 %s1201_s29, %s918_s17  ;;  %s506_s21 = scalar_lea.vmem [#allocation7], %s912_s26 }
  0x6f   : > { %s919_s13 = sshll.u32 %s735_s22, 6  ;;  %s739_s18 = sshll.u32 %s506_s21, 4  ;;  %s1509_s18 = int_to_ptr.vmem [resolvable:$true] %s739_s18 }
  0x70   : > { %1044 = vset.pattern.permute.xlu0 %v1217_v0  ;;  %s544_s11 = scalar_lea.vmem %s1608_s28, %s915_s3  ;;  %s1507_s0 = scalar_lea.hbm %s1609_s15, %s919_s13 }
  0x71   : > { %1042 = vset.pattern.permute.xlu1 %v1218_v1  ;;  %661 = vperm.xlu0 %1044, %v637_v6   ;;  %v638_v43 = vld [vmem:[%s544_s11] sm:$0x7]  ;;  %s723_s29 = scalar_lea.sflag [#allocation6], %s504_s23  ;;  %s1089_s16 = scalar_lea.vmem %s1509_s18, 64 }
  0x72   : > { %641 = vperm.xlu1 %1042, %v637_v6   ;;  %v647_v48 = vrot.slane %v638_v43, %v560_v11  ;;  %v657_v52 = vrot.slane %v638_v43, %v1475_v12  ;;  %v667_v53 = vrot.slane %v638_v43, %v1477_v14  ;;  %p1090_p12 = scmp.ne.s32.totalorder %s1509_s18, %s1089_s16  ;;  %s1221_s3 = smov [#allocation7]  }
  0x73   : > { %s1093_s20 = sshll.u32 %s1221_s3, 4  ;;  %s1094_s20 = int_to_ptr.vmem [resolvable:$false] %s1093_s20 }
  0x74   : > { %p1091_p10 = pnand %p1090_p12, %p1610_p0  ;;  %s1095_s25 = scalar_lea.vmem %s1094_s20, 128 }
  0x75   : > { %694 = vperm.xlu0 %1044, %v670_v7   ;;  %p1096_p11 = scmp.lt.s32.totalorder %s1509_s18, %s1094_s20  ;;  %p1097_p13 = scmp.lt.s32.totalorder %s1095_s25, %s1089_s16 }
  0x76   : > { %1043 = vset.pattern.permute.xlu1 %v1220_v4  ;;  %p1092_p4 = pneg %p1091_p10 }
  0x77   : > { %651 = vperm.xlu1 %1043, %v637_v6   ;;  %p1098_p3 = por %p1097_p13, %p1096_p11 }
  0x79   : > { %1048 = vset.pattern.permute.xlu0 %v1218_v1  ;;  %p1099_p5 = pnand %p1098_p3, %p1092_p4 }
  0x7a   : > { %716 = vperm.xlu0 %1048, %v713_v8  }
  0x7b   : > { %1045 = vset.pattern.permute.xlu1 %v1218_v1  ;;  %v690_v1 = vrot.slane %v671_v56, %v1475_v12 }
  0x7c   : > { %674 = vperm.xlu1 %1045, %v670_v7  }
  0x80   : > { %1046 = vset.pattern.permute.xlu1 %v1220_v4 }
  0x81   : > { %684 = vperm.xlu1 %1046, %v670_v7  }
  0x85   : > { %1047 = vset.pattern.permute.xlu1 %v1219_v3 }
  0x86   : > { %704 = vperm.xlu1 %1047, %v670_v7   ;;  %v710_v7 = vrot.slane %v671_v56, %v1482_v18 }
  0xdd   : > { %v576_v15 = vpop.permute.xlu1 %575  ;;  %v556_v16 = vpop.permute.xlu0 %555 }
  0xde   : > { %v562_v21 = vmul.f32 %v561_v17, %v556_v16  ;;  %v582_v28 = vmul.f32 %v581_v20, %v576_v15 }
  0xe2   : > { %v586_v23 = vpop.permute.xlu1 %585  ;;  %v566_v24 = vpop.permute.xlu0 %565 }
  0xe3   : > { %v572_v26 = vmul.f32 %v571_v19, %v566_v24  ;;  %v592_v32 = vmul.f32 %v591_v25, %v586_v23 }
  0xe5   : > { %v573_v29 = vadd.f32 %v572_v26, %v562_v21 }
  0xe6   : > { %v609_v31 = vpop.permute.xlu0 %608 }
  0xe7   : > { %v583_v33 = vadd.f32 %v582_v28, %v573_v29  ;;  %v599_v34 = vpop.permute.xlu1 %598  ;;  %v615_v37 = vmul.f32 %v614_v30, %v609_v31 }
  0xe8   : > { %v605_v35 = vmul.f32 %v604_v27, %v599_v34 }
  0xe9   : > { %v593_v36 = vadd.f32 %v592_v32, %v583_v33 }
  0xeb   : > { %v606_v39 = vadd.f32 %v605_v35, %v593_v36  ;;  %v629_v42 = vpop.permute.xlu0 %628 }
  0xec   : > { %v619_v41 = vpop.permute.xlu1 %618  ;;  %v635_v47 = vmul.f32 %v634_v40, %v629_v42 }
  0xed   : > { %v616_v44 = vadd.f32 %v615_v37, %v606_v39  ;;  %v625_v45 = vmul.f32 %v624_v38, %v619_v41 }
  0xef   : > { %v626_v46 = vadd.f32 %v625_v45, %v616_v44 }
  0xf0   : > { %v662_v55 = vpop.permute.xlu0 %661 }
  0xf1   : > { %v642_v49 = vpop.permute.xlu1 %641  ;;  %v636_v50 = vadd.f32 %v635_v47, %v626_v46  ;;  %v668_v60 = vmul.f32 %v667_v53, %v662_v55 }
  0xf2   : > { %v648_v51 = vmul.f32 %v647_v48, %v642_v49 }
  0xf4   : > { %v649_v57 = vadd.f32 %v648_v51, %v636_v50  ;;  %v695_v3 = vpop.permute.xlu0 %694 }
  0xf5   : > { %v701_v8 = vmul.f32 %v700_v2, %v695_v3 }
  0xf6   : > { %v652_v54 = vpop.permute.xlu1 %651 }
  0xf7   : > { %v658_v58 = vmul.f32 %v657_v52, %v652_v54 }
  0xf9   : > { %v659_v59 = vadd.f32 %v658_v58, %v649_v57  ;;  %v717_v15 = vpop.permute.xlu0 %716 }
  0xfb   : > { %v675_v62 = vpop.permute.xlu1 %674  ;;  %v669_v63 = vadd.f32 %v668_v60, %v659_v59 }
  0xfc   : > { %v681_v0 = vmul.f32 %v680_v61, %v675_v62 }
  0xfe   : > { %v682_v5 = vadd.f32 %v681_v0, %v669_v63 }
 0x100   : > { %v685_v4 = vpop.permute.xlu1 %684 }
 0x101   : > { %v691_v6 = vmul.f32 %v690_v1, %v685_v4 }
 0x103   : > { %v692_v9 = vadd.f32 %v691_v6, %v682_v5 }
 0x105   : > { %v705_v10 = vpop.permute.xlu1 %704  ;;  %v702_v11 = vadd.f32 %v701_v8, %v692_v9 }
 0x106   : > { %v711_v13 = vmul.f32 %v710_v7, %v705_v10 }
 0x108   : > { %v712_v12 = vadd.f32 %v711_v13, %v702_v11 }
 0x10a   : > { %v719_v14 = vadd.f32 %v717_v15, %v712_v12 }
 0x10c   : > { %721 = vst.msk [vmem:[%s506_s21] sm:$0xf] %vm720_vm0, %v719_v14 }
 0x10d   : > { %1102 = shalt.err (!%p1099_p5)
}
 0x10e   : > { %s1103_s28 = scalar_lea.hbm %s1507_s0, 64  ;;  %s1107_s26 = scalar_lea.hbm %s1609_s15, 1024 }
 0x10f   : > { %p1104_p6 = scmp.ne.s32.totalorder %s1507_s0, %s1103_s28  ;;  %p1108_p1 = scmp.lt.u32.totalorder %s1507_s0, %s1609_s15 }
 0x110   : > { %p1109_p8 = scmp.lt.u32.totalorder %s1107_s26, %s1103_s28  ;;  %p1111_p12 = scmp.lt.u32.totalorder %s1103_s28, %s1507_s0 }
 0x111   : > { %p1105_p2 = pnand %p1104_p6, %p1610_p0 }
 0x112   : > { %p1110_p7 = por %p1109_p8, %p1108_p1 }
 0x113   : > { %p1106_p9 = pneg %p1105_p2 }
 0x114   : > { %p1112_p10 = por %p1111_p12, %p1110_p7 }
 0x116   : > { %p1113_p4 = pnand %p1112_p10, %p1106_p9 }
 0x118   : > { %1116 = shalt.err (!%p1113_p4)
}
 0x119   : > { %928 = dma.vmem_to_hbm [thread:$0]  (%p1610_p0), %s1509_s18, 64, %s1507_s0, %s723_s29  }
 0x11a PF: > { %s1611_s13 = sld [smem:[#allocation13_spill]]  ;;  %s1612_s21 = sld [smem:[#allocation20_spill]] }
 0x11b   : > { %p941_p11 = scmp.ge.s32.totalorder %s1213_s12, 2 }
 0x120   : > { %s751_s19 = sand.u32 1, %s1611_s13   ;;  %p1613_p13 = scmp.ne.s32.totalorder %s1612_s21, 0 }
 0x121   : > { %s752_s14 = scalar_lea.sflag [#allocation6], %s751_s19 }
 0x122   : > { %p937_p3 = pnand %p941_p11, %p1613_p13 }
 0x124   : > { %1168 = dma.done.wait (!%p937_p3), %s752_s14, 64  }
 0x125   : > { %1170 = vsyncadd (!%p937_p3), %s752_s14, 4294967232  ;;  %s30_s12 = sadd.s32 1, %s1213_s12   ;;  %s1614_s16 = sld [smem:[#allocation14_spill]] }
 0x126   : > { %p27_p5 = scmp.ge.s32.totalorder %s30_s12, 18   ;;  %s1615_s25 = sld [smem:[#allocation19_spill]] }
 0x127   : > { %s1616_s10 = sld [smem:[#allocation15_spill]]  ;;  %s1617_s28 = sld [smem:[#allocation21_spill]] }
 0x128   : > { %s1618_s29 = sld [smem:[#allocation16_spill]]  ;;  %s1619_s18 = sld [smem:[#allocation17_spill]] }
 0x129   : > { %s1620_s11 = sld [smem:[#allocation18_spill]]  ;;  %s1621_s23 = smov %s1177_s24 }
 0x12a   : > { %s1623_s26 = smov %s1189_s27  ;;  %s1625_s0 = smov %s1205_s30 }
 0x12b   : > { %s1622_s24 = smov %s1614_s16  ;;  %29 = sbr.rel (!%p27_p5) target bundleno = 22 (0x16), region = 113 }
 0x12d   : > { %s1624_s27 = smov %s1616_s10 }
 0x12e   : > { %s1626_s30 = smov %s1619_s18 }
 0x132   :  { %757 = vsyncpa [#allocation5], 1 }
 0x133   :  { %759 = vsyncpa [#allocation5 + $0x1], 1 }
 0x134   :  { %760 = vsyncpa [#allocation6], 1 }
 0x135   :  { %762 = vsyncpa [#allocation6 + $0x1], 1 }

</bundles_post_ra>
